<compile_context>
chip_gen: v7x
topology: tpu7x:2x2x1
jax: 0.10.0
libtpu: 0.0.40
codegen_flags: <defaults>
</compile_context>

<pallas_src>
import math
import functools

import jax
import jax.numpy as jnp
from jax.experimental import pallas as pl
from jax.experimental.pallas import tpu as pltpu


def mla_kernel(hs_ref,
               wq_ref, bq_ref,
               wk_ref, bk_ref,
               wv_ref, bv_ref,
               wku_ref, bku_ref,
               wvu_ref, bvu_ref,
               ctx_ref, lk_ref, lv_ref,
               lk_s, lv_s, k_s, v_s,
               *, scale, q_block):
    h = pl.program_id(1)
    qi = pl.program_id(2)

    # ---- (1) Latent projections: once per batch element (first head / first
    # query tile).  Kept resident in VMEM scratch for all inner grid steps and
    # written straight to the lk / lv outputs (the latent KV "cache").
    @pl.when(jnp.logical_and(h == 0, qi == 0))
    def _():
        hs = hs_ref[...]                                                    # (S, H)
        lk = jnp.dot(hs, wk_ref[...], preferred_element_type=jnp.float32) + bk_ref[...]
        lv = jnp.dot(hs, wv_ref[...], preferred_element_type=jnp.float32) + bv_ref[...]
        lk_s[...] = lk
        lv_s[...] = lv
        lk_ref[...] = lk.astype(lk_ref.dtype)
        lv_ref[...] = lv.astype(lv_ref.dtype)

    # ---- (2) Per-head K / V up-projection: once per (batch, head), reused by
    # every query tile of this head.
    @pl.when(qi == 0)
    def _():
        k_s[...] = jnp.dot(lk_s[...], wku_ref[...],
                           preferred_element_type=jnp.float32) + bku_ref[...]
        v_s[...] = jnp.dot(lv_s[...], wvu_ref[...],
                           preferred_element_type=jnp.float32) + bvu_ref[...]

    # ---- (3) Q projection for this query tile only; fold 1/sqrt(head_size)
    # into Q once instead of scaling every (tq, S) score tile.
    start = pl.multiple_of(qi * q_block, q_block)
    hs_q = hs_ref[pl.ds(start, q_block), :]                                 # (tq, H)
    q = jnp.dot(hs_q, wq_ref[...], preferred_element_type=jnp.float32) + bq_ref[...]
    q = q * scale                                                           # (tq, hd)

    # ---- (4) Scores: contract the head dim of both operands directly
    # (A @ B^T form) -> no explicit .T, the MXU is fed without an XLU transpose.
    scores = jax.lax.dot_general(
        q, k_s[...],
        dimension_numbers=(((1,), (1,)), ((), ())),
        preferred_element_type=jnp.float32)                                 # (tq, S)

    # Numerically-stable softmax; normalize with the EUP approximate
    # reciprocal (frees the VALU divide slot).
    scores = scores - jnp.max(scores, axis=-1, keepdims=True)
    e = jnp.exp(scores)
    denom = jnp.sum(e, axis=-1, keepdims=True)
    probs = e * pl.reciprocal(denom, approx=True)
    # attention dropout is the identity in eval mode; attention_mask / head_mask
    # are None in this forward.
    # TODO(synk): training-mode dropout and the past_key_value decode path are
    # not implemented.

    ctx = jnp.dot(probs, v_s[...], preferred_element_type=jnp.float32)      # (tq, hd)
    ctx_ref[...] = ctx.astype(ctx_ref.dtype)


def mla_forward(hidden_states, params, num_heads, q_block=None):
    """Returns (context_layer, latent_key, latent_value) matching the torch
    module's (context_layer, past_key_value) outputs."""
    B, S, H = hidden_states.shape
    all_head = params["wq"].shape[1]
    latent = params["wk"].shape[1]
    hd = all_head // num_heads

    if q_block is None:
        q_block = min(S, 256)
    if S % q_block != 0:
        q_block = S
    nq = S // q_block

    # Head-major weight layout, prepared once in XLA outside the kernel:
    #   (in, nh*hd) -> (nh, in, hd)   /   (1, nh*hd) -> (nh, 1, hd)
    def w_heads(w):
        return w.reshape(w.shape[0], num_heads, hd).transpose(1, 0, 2)

    def b_heads(b):
        return b.reshape(1, num_heads, hd).transpose(1, 0, 2)

    wq_h, bq_h = w_heads(params["wq"]), b_heads(params["bq"])
    wku_h, bku_h = w_heads(params["wku"]), b_heads(params["bku"])
    wvu_h, bvu_h = w_heads(params["wvu"]), b_heads(params["bvu"])

    kernel = functools.partial(mla_kernel, scale=1.0 / math.sqrt(hd), q_block=q_block)

    head_w_spec = pl.BlockSpec((None, H, hd), lambda b, h, q: (h, 0, 0))
    head_wu_spec = pl.BlockSpec((None, latent, hd), lambda b, h, q: (h, 0, 0))
    head_b_spec = pl.BlockSpec((None, 1, hd), lambda b, h, q: (h, 0, 0))
    # Grid-invariant (small) latent projection weights: whole-array blocks,
    # same block every step -> stay resident.
    lat_w_spec = pl.BlockSpec((H, latent), lambda b, h, q: (0, 0))
    lat_b_spec = pl.BlockSpec((1, latent), lambda b, h, q: (0, 0))

    ctx_heads, lk, lv = pl.pallas_call(
        kernel,
        grid=(B, num_heads, nq),
        in_specs=[
            pl.BlockSpec((None, S, H), lambda b, h, q: (b, 0, 0)),   # hidden_states
            head_w_spec, head_b_spec,                                # Wq, bq  (head-major)
            lat_w_spec, lat_b_spec,                                  # Wk, bk
            lat_w_spec, lat_b_spec,                                  # Wv, bv
            head_wu_spec, head_b_spec,                               # Wku, bku (head-major)
            head_wu_spec, head_b_spec,                               # Wvu, bvu (head-major)
        ],
        out_specs=[
            pl.BlockSpec((None, None, q_block, hd), lambda b, h, q: (b, h, q, 0)),
            pl.BlockSpec((None, S, latent), lambda b, h, q: (b, 0, 0)),
            pl.BlockSpec((None, S, latent), lambda b, h, q: (b, 0, 0)),
        ],
        out_shape=[
            jax.ShapeDtypeStruct((B, num_heads, S, hd), jnp.float32),  # per-head context
            jax.ShapeDtypeStruct((B, S, latent), jnp.float32),         # latent key
            jax.ShapeDtypeStruct((B, S, latent), jnp.float32),         # latent value
        ],
        scratch_shapes=[
            pltpu.VMEM((S, latent), jnp.float32),   # latent key   (per batch)
            pltpu.VMEM((S, latent), jnp.float32),   # latent value (per batch)
            pltpu.VMEM((S, hd), jnp.float32),       # up-projected K (per batch, head)
            pltpu.VMEM((S, hd), jnp.float32),       # up-projected V (per batch, head)
        ],
        compiler_params=pltpu.CompilerParams(
            dimension_semantics=("parallel", "arbitrary", "arbitrary")),
    )(
        hidden_states,
        wq_h, bq_h,
        params["wk"], params["bk"],
        params["wv"], params["bv"],
        wku_h, bku_h,
        wvu_h, bvu_h,
    )

    # Head merge == torch's permute(0, 2, 1, 3).reshape(B, S, all_head).
    # Pure layout plumbing, done once in XLA outside the kernel.
    ctx = ctx_heads.transpose(0, 2, 1, 3).reshape(B, S, all_head)
    return ctx, lk, lv


def mla_reference(hs, p, num_heads):
    """Pure-JAX reference replicating the torch forward exactly."""
    q = hs @ p["wq"] + p["bq"][0]
    lk = hs @ p["wk"] + p["bk"][0]
    lv = hs @ p["wv"] + p["bv"][0]
    k = lk @ p["wku"] + p["bku"][0]
    v = lv @ p["wvu"] + p["bvu"][0]
    B, S, A = q.shape
    hd = A // num_heads
    qh = q.reshape(B, S, num_heads, hd).transpose(0, 2, 1, 3)
    kh = k.reshape(B, S, num_heads, hd).transpose(0, 2, 1, 3)
    vh = v.reshape(B, S, num_heads, hd).transpose(0, 2, 1, 3)
    scores = jnp.einsum("bhqd,bhkd->bhqk", qh, kh) / math.sqrt(hd)
    probs = jax.nn.softmax(scores, axis=-1)
    ctx = jnp.einsum("bhqk,bhkd->bhqd", probs, vh)
    ctx = ctx.transpose(0, 2, 1, 3).reshape(B, S, A)
    return ctx, lk, lv


if __name__ == "__main__":
    # config: hidden_size=32, num_attention_heads=4 -> head_size=8,
    # all_head_size=32, latent_size=all_head_size//4=8
    B, S, H = 2, 8, 32
    num_heads = 4
    all_head = H
    latent = all_head // 4

    key = jax.random.PRNGKey(0)
    ks = jax.random.split(key, 11)
    params = {
        "wq": 0.02 * jax.random.normal(ks[0], (H, all_head), jnp.float32),
        "bq": 0.02 * jax.random.normal(ks[1], (1, all_head), jnp.float32),
        "wk": 0.02 * jax.random.normal(ks[2], (H, latent), jnp.float32),
        "bk": 0.02 * jax.random.normal(ks[3], (1, latent), jnp.float32),
        "wv": 0.02 * jax.random.normal(ks[4], (H, latent), jnp.float32),
        "bv": 0.02 * jax.random.normal(ks[5], (1, latent), jnp.float32),
        "wku": 0.02 * jax.random.normal(ks[6], (latent, all_head), jnp.float32),
        "bku": 0.02 * jax.random.normal(ks[7], (1, all_head), jnp.float32),
        "wvu": 0.02 * jax.random.normal(ks[8], (latent, all_head), jnp.float32),
        "bvu": 0.02 * jax.random.normal(ks[9], (1, all_head), jnp.float32),
    }
    hidden_states = jax.random.normal(ks[10], (B, S, H), jnp.float32)

    ctx, lk, lv = mla_forward(hidden_states, params, num_heads)
    jax.block_until_ready((ctx, lk, lv))

    ctx_ref, lk_ref, lv_ref = mla_reference(hidden_states, params, num_heads)
    # ctx tolerance is relaxed slightly for the EUP approximate reciprocal used
    # in the softmax normalization.
    assert jnp.allclose(ctx, ctx_ref, rtol=1e-2, atol=5e-4), "context mismatch"
    assert jnp.allclose(lk, lk_ref, rtol=1e-4, atol=1e-6), "latent key mismatch"
    assert jnp.allclose(lv, lv_ref, rtol=1e-4, atol=1e-6), "latent value mismatch"

    print("KERNEL_OK")
</pallas_src>

<mosaic_0001>
module attributes {stable_mosaic.version = 11 : i64} {
  func.func @mla_kernel(%arg0: i32, %arg1: i32, %arg2: i32, %arg3: memref<1x8x32xf32, #tpu.memory_space<vmem>>, %arg4: memref<1x32x8xf32, #tpu.memory_space<vmem>>, %arg5: memref<1x1x8xf32, #tpu.memory_space<vmem>>, %arg6: memref<32x8xf32, #tpu.memory_space<vmem>>, %arg7: memref<1x8xf32, #tpu.memory_space<vmem>>, %arg8: memref<32x8xf32, #tpu.memory_space<vmem>>, %arg9: memref<1x8xf32, #tpu.memory_space<vmem>>, %arg10: memref<1x8x8xf32, #tpu.memory_space<vmem>>, %arg11: memref<1x1x8xf32, #tpu.memory_space<vmem>>, %arg12: memref<1x8x8xf32, #tpu.memory_space<vmem>>, %arg13: memref<1x1x8xf32, #tpu.memory_space<vmem>>, %arg14: memref<1x1x8x8xf32, #tpu.memory_space<vmem>>, %arg15: memref<1x8x8xf32, #tpu.memory_space<vmem>>, %arg16: memref<1x8x8xf32, #tpu.memory_space<vmem>>, %arg17: memref<8x8xf32, #tpu.memory_space<vmem>>, %arg18: memref<8x8xf32, #tpu.memory_space<vmem>>, %arg19: memref<8x8xf32, #tpu.memory_space<vmem>>, %arg20: memref<8x8xf32, #tpu.memory_space<vmem>>) attributes {dimension_semantics = [#tpu.dimension_semantics<parallel>, #tpu.dimension_semantics<arbitrary>, #tpu.dimension_semantics<arbitrary>], iteration_bounds = array<i64: 2, 4, 1>, scalar_prefetch = 0 : i64, scratch_operands = 4 : i64, tpu.core_type = #tpu.core_type<tc>, window_params = [{transform_indices = @transform_0, window_bounds = array<i64: 1, 8, 32>}, {transform_indices = @transform_1, window_bounds = array<i64: 1, 32, 8>}, {transform_indices = @transform_2, window_bounds = array<i64: 1, 1, 8>}, {pipeline_mode = #tpu.pipeline_mode<synchronous>, transform_indices = @transform_3, window_bounds = array<i64: 32, 8>}, {pipeline_mode = #tpu.pipeline_mode<synchronous>, transform_indices = @transform_4, window_bounds = array<i64: 1, 8>}, {pipeline_mode = #tpu.pipeline_mode<synchronous>, transform_indices = @transform_5, window_bounds = array<i64: 32, 8>}, {pipeline_mode = #tpu.pipeline_mode<synchronous>, transform_indices = @transform_6, window_bounds = array<i64: 1, 8>}, {transform_indices = @transform_7, window_bounds = array<i64: 1, 8, 8>}, {transform_indices = @transform_8, window_bounds = array<i64: 1, 1, 8>}, {transform_indices = @transform_9, window_bounds = array<i64: 1, 8, 8>}, {transform_indices = @transform_10, window_bounds = array<i64: 1, 1, 8>}, {transform_indices = @transform_11, window_bounds = array<i64: 1, 1, 8, 8>}, {transform_indices = @transform_12, window_bounds = array<i64: 1, 8, 8>}, {transform_indices = @transform_13, window_bounds = array<i64: 1, 8, 8>}]} {
    %c0_i32 = arith.constant 0 : i32
    %0 = arith.cmpi eq, %arg1, %c0_i32 : i32
    %c0_i32_0 = arith.constant 0 : i32
    %1 = arith.cmpi eq, %arg2, %c0_i32_0 : i32
    %2 = arith.andi %0, %1 : i1
    %3 = arith.extui %2 : i1 to i32
    %c0_i32_1 = arith.constant 0 : i32
    %4 = arith.cmpi ne, %3, %c0_i32_1 : i32
    scf.if %4 {
      %c0_24 = arith.constant 0 : index
      %c0_25 = arith.constant 0 : index
      %c0_26 = arith.constant 0 : index
      %39 = vector.load %arg3[%c0_24, %c0_25, %c0_26] : memref<1x8x32xf32, #tpu.memory_space<vmem>>, vector<1x8x32xf32>
      %40 = vector.shape_cast %39 : vector<1x8x32xf32> to vector<8x32xf32>
      %c0_27 = arith.constant 0 : index
      %c0_28 = arith.constant 0 : index
      %41 = vector.load %arg6[%c0_27, %c0_28] : memref<32x8xf32, #tpu.memory_space<vmem>>, vector<32x8xf32>
      %cst_29 = arith.constant dense<0.000000e+00> : vector<8x8xf32>
      %42 = tpu.matmul %40, %41, %cst_29 {dimension_numbers = #tpu.dot_dimension_numbers<[1], [0], [0], [1], [0, 0, 1, 1], [], []>} : vector<8x32xf32>, vector<32x8xf32>, vector<8x8xf32> -> vector<8x8xf32>
      %c0_30 = arith.constant 0 : index
      %c0_31 = arith.constant 0 : index
      %43 = vector.load %arg7[%c0_30, %c0_31] : memref<1x8xf32, #tpu.memory_space<vmem>>, vector<1x8xf32>
      %44 = vector.broadcast %43 : vector<1x8xf32> to vector<8x8xf32>
      %45 = arith.addf %42, %44 : vector<8x8xf32>
      %c0_32 = arith.constant 0 : index
      %c0_33 = arith.constant 0 : index
      %46 = vector.load %arg8[%c0_32, %c0_33] : memref<32x8xf32, #tpu.memory_space<vmem>>, vector<32x8xf32>
      %cst_34 = arith.constant dense<0.000000e+00> : vector<8x8xf32>
      %47 = tpu.matmul %40, %46, %cst_34 {dimension_numbers = #tpu.dot_dimension_numbers<[1], [0], [0], [1], [0, 0, 1, 1], [], []>} : vector<8x32xf32>, vector<32x8xf32>, vector<8x8xf32> -> vector<8x8xf32>
      %c0_35 = arith.constant 0 : index
      %c0_36 = arith.constant 0 : index
      %48 = vector.load %arg9[%c0_35, %c0_36] : memref<1x8xf32, #tpu.memory_space<vmem>>, vector<1x8xf32>
      %49 = vector.broadcast %48 : vector<1x8xf32> to vector<8x8xf32>
      %50 = arith.addf %47, %49 : vector<8x8xf32>
      %c0_37 = arith.constant 0 : index
      %c0_38 = arith.constant 0 : index
      %51 = vector.load %arg17[%c0_37, %c0_38] : memref<8x8xf32, #tpu.memory_space<vmem>>, vector<8x8xf32>
      tpu.vector_store %arg17[%c0_37, %c0_38], %45 {strides = array<i32>} : memref<8x8xf32, #tpu.memory_space<vmem>>, vector<8x8xf32>,
      %c0_39 = arith.constant 0 : index
      %c0_40 = arith.constant 0 : index
      %52 = vector.load %arg18[%c0_39, %c0_40] : memref<8x8xf32, #tpu.memory_space<vmem>>, vector<8x8xf32>
      tpu.vector_store %arg18[%c0_39, %c0_40], %50 {strides = array<i32>} : memref<8x8xf32, #tpu.memory_space<vmem>>, vector<8x8xf32>,
      %c0_41 = arith.constant 0 : index
      %c0_42 = arith.constant 0 : index
      %c0_43 = arith.constant 0 : index
      %53 = vector.load %arg15[%c0_41, %c0_42, %c0_43] : memref<1x8x8xf32, #tpu.memory_space<vmem>>, vector<1x8x8xf32>
      %54 = vector.shape_cast %53 : vector<1x8x8xf32> to vector<8x8xf32>
      %55 = vector.shape_cast %45 : vector<8x8xf32> to vector<1x8x8xf32>
      tpu.vector_store %arg15[%c0_41, %c0_42, %c0_43], %55 {strides = array<i32>} : memref<1x8x8xf32, #tpu.memory_space<vmem>>, vector<1x8x8xf32>,
      %c0_44 = arith.constant 0 : index
      %c0_45 = arith.constant 0 : index
      %c0_46 = arith.constant 0 : index
      %56 = vector.load %arg16[%c0_44, %c0_45, %c0_46] : memref<1x8x8xf32, #tpu.memory_space<vmem>>, vector<1x8x8xf32>
      %57 = vector.shape_cast %56 : vector<1x8x8xf32> to vector<8x8xf32>
      %58 = vector.shape_cast %50 : vector<8x8xf32> to vector<1x8x8xf32>
      tpu.vector_store %arg16[%c0_44, %c0_45, %c0_46], %58 {strides = array<i32>} : memref<1x8x8xf32, #tpu.memory_space<vmem>>, vector<1x8x8xf32>,
    } else {
    }
    %c0_i32_2 = arith.constant 0 : i32
    %5 = arith.cmpi eq, %arg2, %c0_i32_2 : i32
    %6 = arith.extui %5 : i1 to i32
    %c0_i32_3 = arith.constant 0 : i32
    %7 = arith.cmpi ne, %6, %c0_i32_3 : i32
    scf.if %7 {
      %c0_24 = arith.constant 0 : index
      %c0_25 = arith.constant 0 : index
      %39 = vector.load %arg17[%c0_24, %c0_25] : memref<8x8xf32, #tpu.memory_space<vmem>>, vector<8x8xf32>
      %c0_26 = arith.constant 0 : index
      %c0_27 = arith.constant 0 : index
      %c0_28 = arith.constant 0 : index
      %40 = vector.load %arg10[%c0_26, %c0_27, %c0_28] : memref<1x8x8xf32, #tpu.memory_space<vmem>>, vector<1x8x8xf32>
      %41 = vector.shape_cast %40 : vector<1x8x8xf32> to vector<8x8xf32>
      %cst_29 = arith.constant dense<0.000000e+00> : vector<8x8xf32>
      %42 = tpu.matmul %39, %41, %cst_29 {dimension_numbers = #tpu.dot_dimension_numbers<[1], [0], [0], [1], [0, 0, 1, 1], [], []>} : vector<8x8xf32>, vector<8x8xf32>, vector<8x8xf32> -> vector<8x8xf32>
      %c0_30 = arith.constant 0 : index
      %c0_31 = arith.constant 0 : index
      %c0_32 = arith.constant 0 : index
      %43 = vector.load %arg11[%c0_30, %c0_31, %c0_32] : memref<1x1x8xf32, #tpu.memory_space<vmem>>, vector<1x1x8xf32>
      %44 = vector.shape_cast %43 : vector<1x1x8xf32> to vector<1x8xf32>
      %45 = vector.broadcast %44 : vector<1x8xf32> to vector<8x8xf32>
      %46 = arith.addf %42, %45 : vector<8x8xf32>
      %c0_33 = arith.constant 0 : index
      %c0_34 = arith.constant 0 : index
      %47 = vector.load %arg19[%c0_33, %c0_34] : memref<8x8xf32, #tpu.memory_space<vmem>>, vector<8x8xf32>
      tpu.vector_store %arg19[%c0_33, %c0_34], %46 {strides = array<i32>} : memref<8x8xf32, #tpu.memory_space<vmem>>, vector<8x8xf32>,
      %c0_35 = arith.constant 0 : index
      %c0_36 = arith.constant 0 : index
      %48 = vector.load %arg18[%c0_35, %c0_36] : memref<8x8xf32, #tpu.memory_space<vmem>>, vector<8x8xf32>
      %c0_37 = arith.constant 0 : index
      %c0_38 = arith.constant 0 : index
      %c0_39 = arith.constant 0 : index
      %49 = vector.load %arg12[%c0_37, %c0_38, %c0_39] : memref<1x8x8xf32, #tpu.memory_space<vmem>>, vector<1x8x8xf32>
      %50 = vector.shape_cast %49 : vector<1x8x8xf32> to vector<8x8xf32>
      %cst_40 = arith.constant dense<0.000000e+00> : vector<8x8xf32>
      %51 = tpu.matmul %48, %50, %cst_40 {dimension_numbers = #tpu.dot_dimension_numbers<[1], [0], [0], [1], [0, 0, 1, 1], [], []>} : vector<8x8xf32>, vector<8x8xf32>, vector<8x8xf32> -> vector<8x8xf32>
      %c0_41 = arith.constant 0 : index
      %c0_42 = arith.constant 0 : index
      %c0_43 = arith.constant 0 : index
      %52 = vector.load %arg13[%c0_41, %c0_42, %c0_43] : memref<1x1x8xf32, #tpu.memory_space<vmem>>, vector<1x1x8xf32>
      %53 = vector.shape_cast %52 : vector<1x1x8xf32> to vector<1x8xf32>
      %54 = vector.broadcast %53 : vector<1x8xf32> to vector<8x8xf32>
      %55 = arith.addf %51, %54 : vector<8x8xf32>
      %c0_44 = arith.constant 0 : index
      %c0_45 = arith.constant 0 : index
      %56 = vector.load %arg20[%c0_44, %c0_45] : memref<8x8xf32, #tpu.memory_space<vmem>>, vector<8x8xf32>
      tpu.vector_store %arg20[%c0_44, %c0_45], %55 {strides = array<i32>} : memref<8x8xf32, #tpu.memory_space<vmem>>, vector<8x8xf32>,
    } else {
    }
    %c8_i32 = arith.constant 8 : i32
    %8 = arith.muli %arg2, %c8_i32 : i32
    %9 = tpu.assume_multiple %8, 8 : i32
    %c0 = arith.constant 0 : index
    %10 = arith.index_cast %9 : i32 to index
    %c0_4 = arith.constant 0 : index
    %11 = vector.load %arg3[%c0, %10, %c0_4] : memref<1x8x32xf32, #tpu.memory_space<vmem>>, vector<1x8x32xf32>
    %12 = vector.shape_cast %11 : vector<1x8x32xf32> to vector<8x32xf32>
    %c0_5 = arith.constant 0 : index
    %c0_6 = arith.constant 0 : index
    %c0_7 = arith.constant 0 : index
    %13 = vector.load %arg4[%c0_5, %c0_6, %c0_7] : memref<1x32x8xf32, #tpu.memory_space<vmem>>, vector<1x32x8xf32>
    %14 = vector.shape_cast %13 : vector<1x32x8xf32> to vector<32x8xf32>
    %cst = arith.constant dense<0.000000e+00> : vector<8x8xf32>
    %15 = tpu.matmul %12, %14, %cst {dimension_numbers = #tpu.dot_dimension_numbers<[1], [0], [0], [1], [0, 0, 1, 1], [], []>} : vector<8x32xf32>, vector<32x8xf32>, vector<8x8xf32> -> vector<8x8xf32>
    %c0_8 = arith.constant 0 : index
    %c0_9 = arith.constant 0 : index
    %c0_10 = arith.constant 0 : index
    %16 = vector.load %arg5[%c0_8, %c0_9, %c0_10] : memref<1x1x8xf32, #tpu.memory_space<vmem>>, vector<1x1x8xf32>
    %17 = vector.shape_cast %16 : vector<1x1x8xf32> to vector<1x8xf32>
    %18 = vector.broadcast %17 : vector<1x8xf32> to vector<8x8xf32>
    %19 = arith.addf %15, %18 : vector<8x8xf32>
    %cst_11 = arith.constant 0.353553385 : f32
    %20 = vector.broadcast %cst_11 : f32 to vector<8x8xf32>
    %21 = arith.mulf %19, %20 : vector<8x8xf32>
    %c0_12 = arith.constant 0 : index
    %c0_13 = arith.constant 0 : index
    %22 = vector.load %arg19[%c0_12, %c0_13] : memref<8x8xf32, #tpu.memory_space<vmem>>, vector<8x8xf32>
    %cst_14 = arith.constant dense<0.000000e+00> : vector<8x8xf32>
    %23 = tpu.matmul %21, %22, %cst_14 {dimension_numbers = #tpu.dot_dimension_numbers<[1], [1], [0], [0], [0, 0, 1, 0], [], []>} : vector<8x8xf32>, vector<8x8xf32>, vector<8x8xf32> -> vector<8x8xf32>
    %cst_15 = arith.constant dense<0xFF800000> : vector<8xf32>
    %24 = vector.multi_reduction <maximumf>, %23, %cst_15 [1] : vector<8x8xf32> to vector<8xf32>
    %25 = vector.shape_cast %24 : vector<8xf32> to vector<8x1xf32>
    %26 = vector.broadcast %25 : vector<8x1xf32> to vector<8x8xf32>
    %27 = arith.subf %23, %26 : vector<8x8xf32>
    %28 = math.exp %27 : vector<8x8xf32>
    %cst_16 = arith.constant dense<0.000000e+00> : vector<8xf32>
    %29 = vector.multi_reduction <add>, %28, %cst_16 [1] : vector<8x8xf32> to vector<8xf32>
    %30 = vector.shape_cast %29 : vector<8xf32> to vector<8x1xf32>
    %31 = tpu.reciprocal %30 {approx = true} : vector<8x1xf32> -> vector<8x1xf32>
    %32 = vector.broadcast %31 : vector<8x1xf32> to vector<8x8xf32>
    %33 = arith.mulf %28, %32 : vector<8x8xf32>
    %c0_17 = arith.constant 0 : index
    %c0_18 = arith.constant 0 : index
    %34 = vector.load %arg20[%c0_17, %c0_18] : memref<8x8xf32, #tpu.memory_space<vmem>>, vector<8x8xf32>
    %cst_19 = arith.constant dense<0.000000e+00> : vector<8x8xf32>
    %35 = tpu.matmul %33, %34, %cst_19 {dimension_numbers = #tpu.dot_dimension_numbers<[1], [0], [0], [1], [0, 0, 1, 1], [], []>} : vector<8x8xf32>, vector<8x8xf32>, vector<8x8xf32> -> vector<8x8xf32>
    %c0_20 = arith.constant 0 : index
    %c0_21 = arith.constant 0 : index
    %c0_22 = arith.constant 0 : index
    %c0_23 = arith.constant 0 : index
    %36 = vector.load %arg14[%c0_20, %c0_21, %c0_22, %c0_23] : memref<1x1x8x8xf32, #tpu.memory_space<vmem>>, vector<1x1x8x8xf32>
    %37 = vector.shape_cast %36 : vector<1x1x8x8xf32> to vector<8x8xf32>
    %38 = vector.shape_cast %35 : vector<8x8xf32> to vector<1x1x8x8xf32>
    tpu.vector_store %arg14[%c0_20, %c0_21, %c0_22, %c0_23], %38 {strides = array<i32>} : memref<1x1x8x8xf32, #tpu.memory_space<vmem>>, vector<1x1x8x8xf32>,
    return
  }
  func.func @transform_0(%arg0: i32, %arg1: i32, %arg2: i32) -> (i32, i32, i32) {
    %c0_i32 = arith.constant 0 : i32
    %c0_i32_0 = arith.constant 0 : i32
    %c0_i32_1 = arith.constant 0 : i32
    return %arg0, %c0_i32, %c0_i32_0 : i32, i32, i32
  }
  func.func @transform_1(%arg0: i32, %arg1: i32, %arg2: i32) -> (i32, i32, i32) {
    %c0_i32 = arith.constant 0 : i32
    %c0_i32_0 = arith.constant 0 : i32
    %c0_i32_1 = arith.constant 0 : i32
    return %arg1, %c0_i32, %c0_i32_0 : i32, i32, i32
  }
  func.func @transform_2(%arg0: i32, %arg1: i32, %arg2: i32) -> (i32, i32, i32) {
    %c0_i32 = arith.constant 0 : i32
    %c0_i32_0 = arith.constant 0 : i32
    %c0_i32_1 = arith.constant 0 : i32
    return %arg1, %c0_i32, %c0_i32_0 : i32, i32, i32
  }
  func.func @transform_3(%arg0: i32, %arg1: i32, %arg2: i32) -> (i32, i32) {
    %c0_i32 = arith.constant 0 : i32
    %c0_i32_0 = arith.constant 0 : i32
    %c0_i32_1 = arith.constant 0 : i32
    return %c0_i32, %c0_i32_0 : i32, i32
  }
  func.func @transform_4(%arg0: i32, %arg1: i32, %arg2: i32) -> (i32, i32) {
    %c0_i32 = arith.constant 0 : i32
    %c0_i32_0 = arith.constant 0 : i32
    %c0_i32_1 = arith.constant 0 : i32
    return %c0_i32, %c0_i32_0 : i32, i32
  }
  func.func @transform_5(%arg0: i32, %arg1: i32, %arg2: i32) -> (i32, i32) {
    %c0_i32 = arith.constant 0 : i32
    %c0_i32_0 = arith.constant 0 : i32
    %c0_i32_1 = arith.constant 0 : i32
    return %c0_i32, %c0_i32_0 : i32, i32
  }
  func.func @transform_6(%arg0: i32, %arg1: i32, %arg2: i32) -> (i32, i32) {
    %c0_i32 = arith.constant 0 : i32
    %c0_i32_0 = arith.constant 0 : i32
    %c0_i32_1 = arith.constant 0 : i32
    return %c0_i32, %c0_i32_0 : i32, i32
  }
  func.func @transform_7(%arg0: i32, %arg1: i32, %arg2: i32) -> (i32, i32, i32) {
    %c0_i32 = arith.constant 0 : i32
    %c0_i32_0 = arith.constant 0 : i32
    %c0_i32_1 = arith.constant 0 : i32
    return %arg1, %c0_i32, %c0_i32_0 : i32, i32, i32
  }
  func.func @transform_8(%arg0: i32, %arg1: i32, %arg2: i32) -> (i32, i32, i32) {
    %c0_i32 = arith.constant 0 : i32
    %c0_i32_0 = arith.constant 0 : i32
    %c0_i32_1 = arith.constant 0 : i32
    return %arg1, %c0_i32, %c0_i32_0 : i32, i32, i32
  }
  func.func @transform_9(%arg0: i32, %arg1: i32, %arg2: i32) -> (i32, i32, i32) {
    %c0_i32 = arith.constant 0 : i32
    %c0_i32_0 = arith.constant 0 : i32
    %c0_i32_1 = arith.constant 0 : i32
    return %arg1, %c0_i32, %c0_i32_0 : i32, i32, i32
  }
  func.func @transform_10(%arg0: i32, %arg1: i32, %arg2: i32) -> (i32, i32, i32) {
    %c0_i32 = arith.constant 0 : i32
    %c0_i32_0 = arith.constant 0 : i32
    %c0_i32_1 = arith.constant 0 : i32
    return %arg1, %c0_i32, %c0_i32_0 : i32, i32, i32
  }
  func.func @transform_11(%arg0: i32, %arg1: i32, %arg2: i32) -> (i32, i32, i32, i32) {
    %c0_i32 = arith.constant 0 : i32
    %c0_i32_0 = arith.constant 0 : i32
    return %arg0, %arg1, %arg2, %c0_i32 : i32, i32, i32, i32
  }
  func.func @transform_12(%arg0: i32, %arg1: i32, %arg2: i32) -> (i32, i32, i32) {
    %c0_i32 = arith.constant 0 : i32
    %c0_i32_0 = arith.constant 0 : i32
    %c0_i32_1 = arith.constant 0 : i32
    return %arg0, %c0_i32, %c0_i32_0 : i32, i32, i32
  }
  func.func @transform_13(%arg0: i32, %arg1: i32, %arg2: i32) -> (i32, i32, i32) {
    %c0_i32 = arith.constant 0 : i32
    %c0_i32_0 = arith.constant 0 : i32
    %c0_i32_1 = arith.constant 0 : i32
    return %arg0, %c0_i32, %c0_i32_0 : i32, i32, i32
  }
}

</mosaic_0001>

<bundles_post_ra>
// kernel: tpu_custom_call.1
= control target key start
LH: loop header
LB: loop body
LE: loop exit
PB: predicated region body
PF: predicated region fallthrough
CT: control target
= control target key end

     0   :  { %s2322_s0 = inlined_call_operand.vmem [shape: f32[2,8,32], index: 0, kind: input, shape index: {}]   ;;  %s2323_s1 = inlined_call_operand.vmem [shape: f32[4,32,8], index: 1, kind: input, shape index: {}]   ;;  %s2324_s2 = inlined_call_operand.vmem [shape: f32[4,1,8], index: 2, kind: input, shape index: {}]   ;;  %s2325_s3 = inlined_call_operand.vmem [shape: f32[32,8], index: 3, kind: input, shape index: {}]   ;;  %s2326_s4 = inlined_call_operand.vmem [shape: f32[1,8], index: 4, kind: input, shape index: {}]   ;;  %s2327_s5 = inlined_call_operand.vmem [shape: f32[32,8], index: 5, kind: input, shape index: {}]   ;;  %s2328_s6 = inlined_call_operand.vmem [shape: f32[1,8], index: 6, kind: input, shape index: {}]   ;;  %s2329_s7 = inlined_call_operand.vmem [shape: f32[4,8,8], index: 7, kind: input, shape index: {}]   ;;  %s2330_s8 = inlined_call_operand.vmem [shape: f32[4,1,8], index: 8, kind: input, shape index: {}]   ;;  %s2331_s9 = inlined_call_operand.vmem [shape: f32[4,8,8], index: 9, kind: input, shape index: {}]   ;;  %s2332_s10 = inlined_call_operand.vmem [shape: f32[4,1,8], index: 10, kind: input, shape index: {}]   ;;  %s2333_s11 = inlined_call_operand.hbm [shape: f32[2,4,8,8], index: 11, kind: output, shape index: {0}]   ;;  %s2334_s12 = inlined_call_operand.hbm [shape: f32[2,8,8], index: 12, kind: output, shape index: {1}]   ;;  %s2335_s13 = inlined_call_operand.hbm [shape: f32[2,8,8], index: 13, kind: output, shape index: {2}]  }
   0x1   :  { %2358 = sst [smem:[#allocation29_spill]] %s2322_s0 }
   0x2   :  { %2359 = sst [smem:[#allocation30_spill]] %s2326_s4 }
   0x3   :  { %2360 = sst [smem:[#allocation31_spill]] %s2328_s6 }
   0x4   :  { %2361 = sst [smem:[#allocation32_spill]] %s2333_s11 }
   0x5   :  { %2362 = sst [smem:[#allocation33_spill]] %s2334_s12 }
   0x6   :  { %2363 = sst [smem:[#allocation34_spill]] %s2335_s13 }
   0x7   :  { %19 = vsyncpa [#allocation7], 0 }
   0x8   :  { %21 = vsyncpa [#allocation7 + $0x1], 0 }
   0x9   :  { %22 = vsyncpa [#allocation9], 0 }
   0xa   :  { %24 = vsyncpa [#allocation9 + $0x1], 0  ;;  %s1935_s25 = smov 0   ;;  %s1937_s26 = smov 0  }
   0xb   :  { %s1939_s27 = smov 0   ;;  %s1941_s28 = smov 0  }
   0xc   :  { %s1943_s29 = smov 0   ;;  %s1945_s30 = smov 0  }
   0xd   :  { %s1947_s14 = smov 0   ;;  %s1949_s15 = smov 0  }
   0xe   :  { %s1951_s16 = smov 0   ;;  %s1953_s17 = smov 0  }
   0xf   :  { %s1955_s18 = smov 0  }
  0x10 LB: > { %2364 = sst [smem:[#allocation13_spill]] %s1818_s26  ;;  %s2337_s19 = sadd.s32 4294967295, %s1854_s18   ;;  %s1854_s18 = sphi %s1955_s18, %s30_s18   ;;  %s1850_s17 = sphi %s1953_s17, %s2416_s17   ;;  %s1846_s16 = sphi %s1951_s16, %s2415_s16   ;;  %s1842_s15 = sphi %s1949_s15, %s2414_s15   ;;  %s1838_s14 = sphi %s1947_s14, %s2413_s14   ;;  %s1834_s30 = sphi %s1945_s30, %s2412_s30   ;;  %s1830_s29 = sphi %s1943_s29, %s2411_s29   ;;  %s1826_s28 = sphi %s1941_s28, %s2410_s28   ;;  %s1822_s27 = sphi %s1939_s27, %s2409_s27   ;;  %s1818_s26 = sphi %s1937_s26, %s2408_s26   ;;  %s1814_s25 = sphi %s1935_s25, %s2407_s25  }
  0x11   : > { %2365 = sst [smem:[#allocation14_spill]] %s1822_s27  ;;  %s45_s21 = sadd.s32 1, %s1846_s16 }
  0x12   : > { %2366 = sst [smem:[#allocation15_spill]] %s1826_s28  ;;  %s49_s22 = sadd.s32 1, %s1850_s17 }
  0x13   : > { %2367 = sst [smem:[#allocation16_spill]] %s1830_s29  ;;  %p47_p0 = scmp.ge.s32.totalorder %s45_s21, 4 }
  0x14   : > { %2368 = sst [smem:[#allocation17_spill]] %s1834_s30  ;;  %s326_s23 = sadd.s32 1, %s1834_s30 }
  0x15   : > { %2369 = sst [smem:[#allocation18_spill]] %s1842_s15  ;;  %p336_p1 = scmp.ne.s32.totalorder %s1834_s30, %s1830_s29 }
  0x16   : > { %2370 = sst [smem:[#allocation19_spill]] %s1846_s16  ;;  %p1999_p2 = scmp.eq.s32.totalorder %s2337_s19, 7 }
  0x17   : > { %2371 = sst [smem:[#allocation20_spill]] %s1850_s17  ;;  %s2418_s21 = smov (%p47_p0, %s45_s21), 0 }
  0x18   : > { %2373 = sst [smem:[#allocation21_spill]] %s2418_s21  ;;  %s2420_s22 = smov (!%p47_p0, %s49_s22), %s1850_s17 }
  0x19   : > { %s320_s20 = ssub.s32 %s1846_s16, %s2418_s21  ;;  %p2010_p3 = por %p1999_p2, %p336_p1 }
  0x1a   : > { %p51_p4 = scmp.ge.s32.totalorder %s2420_s22, 2  ;;  %p342_p5 = scmp.ne.s32.totalorder %s1830_s29, %s1826_s28 }
  0x1b   : > { %s2374_s11 = scalar_select %p2010_p3, 1, 0 }
  0x1c   : > { %s2376_s19 = sadd.s32 4294967294, %s1854_s18   ;;  %s352_s12 = sadd.s32 1, %s1822_s27 }
  0x1d   : > { %2375 = sst [smem:[#allocation22_spill]] %s2374_s11  ;;  %p2018_p6 = scmp.eq.s32.totalorder %s2376_s19, 7 }
  0x1e   : > { %s2422_s22 = smov (%p51_p4, %s2420_s22), 0  ;;  %p362_p8 = scmp.ne.s32.totalorder %s1822_s27, %s1818_s26 }
  0x1f   : > { %2378 = sst [smem:[#allocation23_spill]] %s2422_s22  ;;  %p2027_p7 = por %p2018_p6, %p342_p5 }
  0x20   : > { %s319_s16 = ssub.s32 %s1850_s17, %s2422_s22  ;;  %p368_p9 = scmp.ne.s32.totalorder %s1818_s26, %s1814_s25 }
  0x21   : > { %s2379_s21 = scalar_select %p2027_p7, 1, 0 }
  0x22   : > { %s321_s28 = sor.u32 %s320_s20, %s319_s16  ;;  %p350_p10 = scmp.eq.s32.totalorder %s319_s16, 0 }
  0x23   : > { %2380 = sst [smem:[#allocation24_spill]] %s2379_s21  ;;  %p324_p11 = scmp.eq.s32.totalorder %s321_s28, 0 }
  0x24   : > { %p2039_p12 = por %p362_p8, %p1999_p2  ;;  %p2051_p13 = por %p368_p9, %p2018_p6 }
  0x25   : > { %s2044_s11 = scalar_select %p350_p10, %s1822_s27, %s352_s12  }
  0x26   : > { %s2381_s19 = scalar_select %p2039_p12, 1, 0 }
  0x27   : > { %2383 = sst [smem:[#allocation26_spill]] %s2044_s11  ;;  %p1433_p0 = scmp.ge.s32.totalorder %s1854_s18, 1 }
  0x28   : > { %2382 = sst [smem:[#allocation25_spill]] %s2381_s19  ;;  %p472_p1 = scmp.lt.s32.totalorder %s1854_s18, 9 }
  0x29   : > { %s2047_s6 = scalar_select %p324_p11, %s1834_s30, %s326_s23  }
  0x2a   : > { %s2385_s4 = scalar_select %p2051_p13, 1, 0 }
  0x2b   : > { %2384 = sst [smem:[#allocation27_spill]] %s2047_s6  ;;  %p473_p4 = pnand %p1433_p0, %p472_p1 }
  0x2c   : > { %2386 = sst [smem:[#allocation28_spill]] %s2385_s4  ;;  %s2345_s12 = sand.u32 (!%p473_p4), 1, %s1830_s29  }
  0x2d   : > { %476 = sbr.rel (%p473_p4) target bundleno = 1263 (0x4ef), region = 64  ;;  %s537_s25 = sand.u32 (!%p473_p4), 1, %s1818_s26  }
  0x2e   : > { %s2061_s13 = sshll.u32 (!%p473_p4), %s2345_s12, 3  ;;  %s2063_s28 = sshll.u32 (!%p473_p4), %s537_s25, 3 }
  0x2f   : > { %p547_p2 = scmp.lt.s32.totalorder (!%p473_p4), %s1842_s15, 1  ;;  %p551_p5 = scmp.lt.s32.totalorder (!%p473_p4), %s1838_s14, 3 }
  0x30   : > { %p573_p6 = scmp.eq.s32.totalorder (!%p473_p4), %s1838_s14, 0  ;;  %s2387_s0 = sld [smem:[#allocation29_spill]] (!%p473_p4) }
  0x31   : > { %s539_s26 = scalar_lea.vmem (!%p473_p4), [#allocation8], %s2063_s28 }
  0x34   : > { %s548_s16 = scalar_select %p547_p2, %s1842_s15, 1 }
  0x35   : > { %s2070_s20 = scalar_select %p551_p5, %s1838_s14, 3 }
  0x36   : > { %s1437_s23 = sshll.u32 %s548_s16, 3  ;;  %578 = sbr.rel (!%p573_p6) target bundleno = 280 (0x118), region = 68  ;;  %v580_v0 = vld [vmem:[%s2325_s3] sm:$0xff] (%p573_p6)  ;;  %v581_v1 = vld [vmem:[%s2325_s3 + $0x8] sm:$0xff] (%p573_p6)  ;;  %v1856_v3 = vmov (%p573_p6), 0.0|0.0   ;;  %v582_v6 = vld [vmem:[%s2325_s3 + $0x10] sm:$0xff] (%p573_p6) }
  0x37   : > { %s2075_s25 = scalar_lea.vmem %s2387_s0, %s1437_s23  ;;  %s1465_s22 = sshll.u32 %s2070_s20, 5  ;;  %v665_v2 = vld [vmem:[%s2327_s5] sm:$0xff] (%p573_p6)  ;;  %1543 = vmatprep.subr.bf16.mxu0 (%p573_p6), %v1856_v3  ;;  %1549 = vmatprep.subr.bf16.mxu1 (%p573_p6), %v1856_v3  ;;  %v1544_v4 = vpack.c.bf16 (%p573_p6), %v581_v1, %v580_v0  ;;  %v666_v5 = vld [vmem:[%s2327_s5 + $0x8] sm:$0xff] (%p573_p6)  ;;  %v583_v7 = vld [vmem:[%s2325_s3 + $0x18] sm:$0xff] (%p573_p6)  ;;  %vm1857_vm0 = vmmov (%p573_p6), 0   ;;  %v1858_v11 = vmov (%p573_p6), 0.0  }
  0x38   : > { %s2081_s30 = scalar_lea.vmem %s2323_s1, %s1465_s22  ;;  %s1440_s4 = sshll.u32 %s2070_s20, 3  ;;  %v1550_v8 = vpack.c.bf16 (%p573_p6), %v666_v5, %v665_v2  ;;  %v667_v9 = vld [vmem:[%s2327_s5 + $0x10] sm:$0xff] (%p573_p6)  ;;  %v668_v10 = vld [vmem:[%s2327_s5 + $0x18] sm:$0xff] (%p573_p6)  ;;  %1498 = vmatprep.mubr.msk.f32.mxu0 (%p573_p6), %vm1857_vm0, %v1858_v11  ;;  %1509 = vmatprep.mubr.msk.f32.mxu1 (%p573_p6), %vm1857_vm0, %v1858_v11  ;;  %v1547_v12 = vpack.c.bf16 (%p573_p6), %v583_v7, %v582_v6  ;;  %v579_v14 = vld [vmem:[%s2075_s25] sm:$0xff] (%p573_p6)  ;;  %vm591_vm1 = vcmask (%p573_p6), 261120   ;;  %vm746_vm2 = vcmask (%p573_p6), 64512  }
  0x39   : > { %s565_s16 = scalar_lea.vmem %s2330_s8, %s2070_s20  ;;  %s2095_s12 = scalar_lea.vmem %s2329_s7, %s1440_s4  ;;  %1545 = vmatpush3.bf16.msra.mxu0 (%p573_p6), %v1544_v4  ;;  %v1553_v13 = vpack.c.bf16 (%p573_p6), %v668_v10, %v667_v9 }
  0x3a   : > { %s2100_s6 = scalar_lea.vmem %s2331_s9, %s1440_s4  ;;  %s572_s11 = scalar_lea.vmem %s2332_s10, %s2070_s20  ;;  %1551 = vmatpush3.bf16.msra.mxu1 (%p573_p6), %v1550_v8  ;;  %1546 = vmatprep.subr.bf16.mxu0 (%p573_p6), %v1856_v3 }
  0x3b   : > { %s546_s0 = scalar_lea.vmem [#allocation10], %s2063_s28  ;;  %1552 = vmatprep.subr.bf16.mxu1 (%p573_p6), %v1856_v3  ;;  %s2388_s17 = sld [smem:[#allocation30_spill]] (%p573_p6) }
  0x3c   : > { %s2389_s21 = sld [smem:[#allocation31_spill]] (%p573_p6) }
  0x3d   : > { %1548 = vmatpush3.bf16.msra.mxu0 %v1547_v12 }
  0x3e   : > { %1554 = vmatpush3.bf16.msra.mxu1 %v1553_v13 }
  0x40   : > { %1499 = vmatmul.mubr.msk.f32.vlgmr.msra.gmra.mrb[0].mxu0 %vm591_vm1, %v579_v14 }
  0x41   : > { %1510 = vmatmul.mubr.msk.f32.vlgmr.msra.gmra.mrb[0].mxu1 %vm591_vm1, %v579_v14  ;;  %v1443_v15 = vld [vmem:[%s2388_s17] ss:$0 sm:$0xff] }
  0x42   : > { %v1445_v16 = vld [vmem:[%s2389_s21] ss:$0 sm:$0xff] }
 0x113   : > { %v661_v17 = vpop.f32.mrb[0].mxu0 }
 0x114   : > { %v662_v18 = vadd.f32 %v1443_v15, %v661_v17  ;;  %v742_v19 = vpop.f32.mrb[0].mxu1  ;;  %v1500_v20 = vpop.f32.mrb[1].mxu0 }
 0x115   : > { %v743_v21 = vadd.f32 %v1445_v16, %v742_v19  ;;  %v1511_v22 = vpop.f32.mrb[1].mxu1 }
 0x116   : > { %747 = vst.msk [vmem:[#allocation2] sm:$0xff] %vm746_vm2, %v662_v18  ;;  %749 = vst.msk [vmem:[%s539_s26] sm:$0xff] %vm746_vm2, %v662_v18 }
 0x117   : > { %748 = vst.msk [vmem:[#allocation3] sm:$0xff] %vm746_vm2, %v743_v21  ;;  %750 = vst.msk [vmem:[%s546_s0] sm:$0xff] %vm746_vm2, %v743_v21 }
 0x118 PF: > { %v755_v23 = vld [vmem:[%s2095_s12] sm:$0xff]  ;;  %vm763_vm3 = vcmask 64512   ;;  %v1859_v25 = vmov 0.0   ;;  %vm1860_vm4 = vmmov 0   ;;  %v925_v27 = vld [vmem:[%s2081_s30 + $0x8] sm:$0xff]  ;;  %v926_v28 = vld [vmem:[%s2081_s30 + $0x10] sm:$0xff]  ;;  %s2390_s15 = scalar_lea.vmem %s2324_s2, %s2070_s20 }
 0x119   : > { %1512 = vmatprep.subr.mxu0 %v1859_v25  ;;  %1514 = vmatprep.mubr.msk.f32.mxu0 %vm1860_vm4, %v1859_v25  ;;  %v924_v26 = vld [vmem:[%s2081_s30] sm:$0xff]  ;;  %v927_v30 = vld [vmem:[%s2081_s30 + $0x18] sm:$0xff]  ;;  %v1861_v31 = vmov 0.0|0.0   ;;  %vm935_vm5 = vcmask 261120   ;;  %s2391_s4 = sld [smem:[#allocation18_spill]]  ;;  %s2394_s22 = sld [smem:[#allocation33_spill]] }
 0x11a   : > { %1513 = vmatpush3.msra.mxu0 %v755_v23  ;;  %v1556_v29 = vpack.c.bf16 %v925_v27, %v924_v26  ;;  %1517 = vmatprep.subr.mxu1 %v1859_v25  ;;  %v1559_v32 = vpack.c.bf16 %v927_v30, %v926_v28  ;;  %v923_v33 = vld [vmem:[%s2075_s25] sm:$0xff]  ;;  %s1214_s21 = sshll.u32 %s539_s26, 4  ;;  %s1862_s25 = smov [#allocation8]   ;;  %s1215_s21 = int_to_ptr.vmem [resolvable:$true] %s1214_s21 }
 0x11b   : > { %1555 = vmatprep.subr.bf16.mxu0 %v1861_v31  ;;  %1519 = vmatprep.mubr.msk.f32.mxu1 %vm1860_vm4, %v1859_v25  ;;  %v839_v34 = vld [vmem:[%s2100_s6] sm:$0xff]  ;;  %s1676_s12 = scalar_lea.vmem %s1215_s21, 128  ;;  %s1680_s6 = sshll.u32 %s1862_s25, 4  ;;  %s1681_s6 = int_to_ptr.vmem [resolvable:$false] %s1680_s6 }
 0x11c   : > { %1518 = vmatpush3.msra.mxu1 %v839_v34  ;;  %v1447_v36 = vld [vmem:[%s565_s16] ss:$0 sm:$0xff]  ;;  %p1677_p8 = scmp.ne.s32.totalorder %s1215_s21, %s1676_s12  ;;  %p1683_p11 = scmp.lt.s32.totalorder %s1215_s21, %s1681_s6 }
 0x11d   : > { %v754_v24 = vld [vmem:[#allocation2] sm:$0xff]  ;;  %1533 = vmatprep.subr.mxu1 %v1859_v25 }
 0x11e   : > { %1515 = vmatmul.mubr.msk.f32.vlgmr.msra.gmra.mrb[0].mxu0 %vm763_vm3, %v754_v24  ;;  %v838_v35 = vld [vmem:[#allocation3] sm:$0xff]  ;;  %v1451_v40 = vld [vmem:[%s2390_s15] ss:$0 sm:$0xff]  ;;  %p1678_p9 = pnand %p1677_p8, %p2039_p12  ;;  %s1682_s15 = scalar_lea.vmem %s1681_s6, 256 }
 0x11f   : > { %1557 = vmatpush3.bf16.msra.mxu0 %v1556_v29  ;;  %1530 = vmatprep.mubr.msk.f32.mxu0 %vm1860_vm4, %v1859_v25  ;;  %v1449_v46 = vld [vmem:[%s572_s11] ss:$0 sm:$0xff]  ;;  %s2393_s11 = sadd.s32 4294967295, %s1854_s18   ;;  %s1461_s27 = sshll.u32 %s2391_s4, 7 }
 0x120   : > { %1558 = vmatprep.subr.bf16.mxu0 %v1861_v31  ;;  %1520 = vmatmul.mubr.msk.f32.vlgmr.msra.gmra.mrb[0].mxu1 %vm763_vm3, %v838_v35  ;;  %s2184_s23 = sand.u32 1, %s2393_s11   ;;  %s2192_s29 = scalar_lea.hbm %s2394_s22, %s1461_s27 }
 0x121   : > { %1535 = vmatprep.mubr.msk.f32.mxu1 %vm1860_vm4, %v1859_v25  ;;  %s1180_s30 = scalar_lea.sflag [#allocation9], %s2184_s23  ;;  %p1679_p10 = pneg %p1678_p9 }
 0x122   : > { %p1684_p0 = scmp.lt.s32.totalorder %s1682_s15, %s1676_s12 }
 0x123   : > { %1560 = vmatpush3.bf16.msra.mxu0 %v1559_v32 }
 0x124   : > { %p1685_p1 = por %p1684_p0, %p1683_p11 }
 0x126   : > { %1531 = vmatmul.mubr.msk.f32.vlgmr.msra.gmra.mrb[2].mxu0 %vm935_vm5, %v923_v33  ;;  %p1686_p4 = pnand %p1685_p1, %p1679_p10 }
 0x1f1   : > { %v833_v37 = vpop.f32.mrb[0].mxu0 }
 0x1f2   : > { %v834_v38 = vadd.f32 %v1447_v36, %v833_v37  ;;  %v1516_v39 = vpop.f32.mrb[1].mxu0 }
 0x1f3   : > { %v916_v47 = vpop.f32.mrb[0].mxu1 }
 0x1f4   : > { %837 = vst.msk [vmem:[#allocation4] sm:$0xff] %vm763_vm3, %v834_v38  ;;  %v917_v48 = vadd.f32 %v1449_v46, %v916_v47  ;;  %v1521_v49 = vpop.f32.mrb[1].mxu1 }
 0x1f6   : > { %920 = vst.msk [vmem:[#allocation5] sm:$0xff] %vm763_vm3, %v917_v48 }
 0x1f9   : > { %v1005_v41 = vpop.f32.mrb[2].mxu0 }
 0x1fa   : > { %v1006_v42 = vadd.f32 %v1451_v40, %v1005_v41  ;;  %v1532_v43 = vpop.f32.mrb[3].mxu0 }
 0x1fb   : > { %v1010_v44 = vld [vmem:[#allocation4] sm:$0xff] }
 0x1fc   : > { %v1009_v45 = vmul.f32 0.35355338, %v1006_v42  ;;  %1534 = vmatpush3.xpose.msk.msra.mxu1 %vm763_vm3, %v1010_v44 }
 0x1fd   : > { %1538 = vmatprep.subr.mxu1 %v1859_v25  ;;  %v1099_v50 = vld [vmem:[#allocation5] sm:$0xff] }
 0x1ff   : > { %1536 = vmatmul.mubr.msk.f32.vlgmr.msra.gmra.mrb[2].mxu1 %vm763_vm3, %v1009_v45 }
 0x200   : > { %1540 = vmatprep.mubr.msk.f32.mxu1 %vm1860_vm4, %v1859_v25  ;;  %1539 = vmatpush3.msra.mxu1 %v1099_v50 }
 0x2d2   : > { %v1084_v51 = vpop.f32.mrb[2].mxu1 }
 0x2d3   : > { %v1537_v52 = vpop.f32.mrb[3].mxu1  ;;  %v1088_v53 = vsel %vm763_vm3, %v1084_v51, -inf }
 0x2d4   : > { %1089 = vmax.xlane.f32.xlu0 %v1088_v53 }
 0x361   : > { %v1090_v54 = vpop.xlane.xlu0 %1089 }
 0x362   : > { %v1091_v55 = vsub.f32 %v1084_v51, %v1090_v54 }
 0x364   : > { %v1092_v56 = vmul.f32 1.442695, %v1091_v55 }
 0x366   : > { %1672 = vpow2.f32 %v1092_v56 }
 0x370   : > { %v1673_v57 = vpop.eup %1672 }
 0x371   : > { %v1094_v58 = vsel %vm763_vm3, %v1673_v57, 0.0 }
 0x372   : > { %1095 = vadd.xlane.f32.xlu0 %v1094_v58 }
 0x3ff   : > { %v1096_v59 = vpop.xlane.xlu0 %1095 }
 0x400   : > { %1674 = vrcp.f32 %v1096_v59 }
 0x40a   : > { %v1675_v60 = vpop.eup %1674 }
 0x40b   : > { %v1098_v61 = vmul.f32 %v1675_v60, %v1673_v57 }
 0x40d   : > { %1541 = vmatmul.mubr.msk.f32.vlgmr.msra.gmra.mrb[4].mxu1 %vm763_vm3, %v1098_v61 }
 0x40e   : > { %1689 = shalt.err (!%p1686_p4)
}
 0x40f   : > { %s1690_s26 = scalar_lea.hbm %s2192_s29, 128  ;;  %s1694_s11 = scalar_lea.hbm %s2394_s22, 256 }
 0x410   : > { %p1691_p2 = scmp.ne.s32.totalorder %s2192_s29, %s1690_s26  ;;  %p1695_p8 = scmp.lt.u32.totalorder %s2192_s29, %s2394_s22 }
 0x411   : > { %p1696_p9 = scmp.lt.u32.totalorder %s1694_s11, %s1690_s26  ;;  %p1698_p11 = scmp.lt.u32.totalorder %s1690_s26, %s2192_s29 }
 0x412   : > { %p1692_p5 = pnand %p1691_p2, %p2039_p12 }
 0x413   : > { %p1697_p10 = por %p1696_p9, %p1695_p8 }
 0x414   : > { %p1693_p6 = pneg %p1692_p5 }
 0x415   : > { %p1699_p0 = por %p1698_p11, %p1697_p10 }
 0x417   : > { %p1700_p1 = pnand %p1699_p0, %p1693_p6 }
 0x419   : > { %1703 = shalt.err (!%p1700_p1)
}
 0x41a   : > { %1562 = dma.vmem_to_hbm [thread:$0]  (%p2039_p12), %s1215_s21, 128, %s2192_s29, %s1180_s30  }
 0x41b   : > { %s2395_s6 = sld [smem:[#allocation34_spill]]  ;;  %s1227_s26 = sshll.u32 %s546_s0, 4  ;;  %s1228_s26 = int_to_ptr.vmem [resolvable:$true] %s1227_s26 }
 0x41c   : > { %s1704_s16 = scalar_lea.vmem %s1228_s26, 128  ;;  %s1863_s19 = smov [#allocation10]  }
 0x41d   : > { %p1705_p4 = scmp.ne.s32.totalorder %s1228_s26, %s1704_s16  ;;  %s1708_s11 = sshll.u32 %s1863_s19, 4  ;;  %s1709_s11 = int_to_ptr.vmem [resolvable:$false] %s1708_s11 }
 0x41e   : > { %s1710_s24 = scalar_lea.vmem %s1709_s11, 256  ;;  %p1711_p6 = scmp.lt.s32.totalorder %s1228_s26, %s1709_s11 }
 0x41f   : > { %p1706_p2 = pnand %p1705_p4, %p2039_p12  ;;  %p1712_p8 = scmp.lt.s32.totalorder %s1710_s24, %s1704_s16 }
 0x421   : > { %s2221_s15 = scalar_lea.hbm %s2395_s6, %s1461_s27  ;;  %p1707_p5 = pneg %p1706_p2 }
 0x422   : > { %p1713_p9 = por %p1712_p8, %p1711_p6 }
 0x424   : > { %p1714_p10 = pnand %p1713_p9, %p1707_p5 }
 0x426   : > { %1717 = shalt.err (!%p1714_p10)
}
 0x427   : > { %s1718_s0 = scalar_lea.hbm %s2221_s15, 128  ;;  %s1722_s29 = scalar_lea.hbm %s2395_s6, 256 }
 0x428   : > { %p1719_p11 = scmp.ne.s32.totalorder %s2221_s15, %s1718_s0  ;;  %p1723_p4 = scmp.lt.u32.totalorder %s2221_s15, %s2395_s6 }
 0x429   : > { %p1724_p2 = scmp.lt.u32.totalorder %s1722_s29, %s1718_s0  ;;  %p1726_p6 = scmp.lt.u32.totalorder %s1718_s0, %s2221_s15 }
 0x42a   : > { %p1720_p0 = pnand %p1719_p11, %p2039_p12 }
 0x42b   : > { %p1725_p5 = por %p1724_p2, %p1723_p4 }
 0x42c   : > { %p1721_p1 = pneg %p1720_p0 }
 0x42d   : > { %p1727_p8 = por %p1726_p6, %p1725_p5 }
 0x42f   : > { %p1728_p9 = pnand %p1727_p8, %p1721_p1 }
 0x431   : > { %1731 = shalt.err (!%p1728_p9)
}
 0x432   : > { %s2396_s12 = sld [smem:[#allocation16_spill]]  ;;  %s1459_s16 = sshll.u32 %s2391_s4, 2 }
 0x433   : > { %1563 = dma.vmem_to_hbm [thread:$0]  (%p2039_p12), %s1228_s26, 128, %s2221_s15, %s1180_s30  }
 0x434   : > { %s1197_s19 = sadd.s32 %s1838_s14, %s1459_s16  ;;  %s2398_s24 = scalar_lea.vmem [#allocation6], %s2061_s13 }
 0x435   : > { %s1460_s11 = sshll.u32 %s1197_s19, 7  ;;  %s1201_s0 = sshll.u32 %s2398_s24, 4  ;;  %s2253_s0 = int_to_ptr.vmem [resolvable:$true] %s1201_s0 }
 0x436   : > { %s2399_s29 = sld [smem:[#allocation32_spill]]  ;;  %s2401_s20 = smov %s2398_s24 }
 0x437   : > { %s1732_s23 = scalar_lea.vmem %s2253_s0, 128  ;;  %s1864_s30 = smov [#allocation6]  }
 0x438   : > { %s2402_s4 = sand.u32 1, %s2396_s12   ;;  %p1733_p12 = scmp.ne.s32.totalorder %s2253_s0, %s1732_s23 }
 0x439   : > { %s1175_s14 = scalar_lea.sflag [#allocation7], %s2402_s4  ;;  %s1736_s15 = sshll.u32 %s1864_s30, 4  ;;  %s1737_s15 = int_to_ptr.vmem [resolvable:$false] %s1736_s15 }
 0x43a   : > { %p1734_p10 = pnand %p1733_p12, %p2010_p3  ;;  %s1738_s26 = scalar_lea.vmem %s1737_s15, 256 }
 0x43b   : > { %p1739_p0 = scmp.lt.s32.totalorder %s2253_s0, %s1737_s15  ;;  %p1740_p1 = scmp.lt.s32.totalorder %s1738_s26, %s1732_s23 }
 0x43c   : > { %s2400_s21 = smov %s2399_s29  ;;  %s2251_s17 = scalar_lea.hbm %s2399_s29, %s1460_s11 }
 0x43d   : > { %p1735_p11 = pneg %p1734_p10  ;;  %p1741_p4 = por %p1740_p1, %p1739_p0 }
 0x43f   : > { %p1742_p2 = pnand %p1741_p4, %p1735_p11 }
 0x4e0   : > { %v1169_v62 = vpop.f32.mrb[4].mxu1 }
 0x4e1   : > { %1173 = vst.msk [vmem:[%s2401_s20] sm:$0xff] %vm763_vm3, %v1169_v62  ;;  %v1542_v63 = vpop.f32.mrb[5].mxu1 }
 0x4e2   : > { %1745 = shalt.err (!%p1742_p2)
}
 0x4e3   : > { %s1746_s13 = scalar_lea.hbm %s2251_s17, 128  ;;  %s1750_s19 = scalar_lea.hbm %s2400_s21, 1024 }
 0x4e4   : > { %p1747_p5 = scmp.ne.s32.totalorder %s2251_s17, %s1746_s13  ;;  %p1751_p9 = scmp.lt.u32.totalorder %s2251_s17, %s2400_s21 }
 0x4e5   : > { %p1752_p12 = scmp.lt.u32.totalorder %s1750_s19, %s1746_s13  ;;  %p1754_p11 = scmp.lt.u32.totalorder %s1746_s13, %s2251_s17 }
 0x4e6   : > { %p1748_p6 = pnand %p1747_p5, %p2010_p3 }
 0x4e7   : > { %p1753_p10 = por %p1752_p12, %p1751_p9 }
 0x4e8   : > { %p1749_p8 = pneg %p1748_p6 }
 0x4e9   : > { %p1755_p0 = por %p1754_p11, %p1753_p10 }
 0x4eb   : > { %p1756_p1 = pnand %p1755_p0, %p1749_p8 }
 0x4ed   : > { %1759 = shalt.err (!%p1756_p1)
}
 0x4ee   : > { %1561 = dma.vmem_to_hbm [thread:$0]  (%p2010_p3), %s2253_s0, 128, %s2251_s17, %s1175_s14  }
 0x4ef PF: > { %s2403_s28 = sld [smem:[#allocation15_spill]]  ;;  %p1577_p4 = scmp.ge.s32.totalorder %s1854_s18, 2 }
 0x4f1   : > { %p1568_p2 = pnand %p1577_p4, %p2027_p7 }
 0x4f5   : > { %s1239_s29 = sand.u32 1, %s2403_s28  }
 0x4f6   : > { %s1240_s20 = scalar_lea.sflag [#allocation7], %s1239_s29 }
 0x4f7   : > { %1805 = dma.done.wait (!%p1568_p2), %s1240_s20, 128  }
 0x4f8   : > { %1807 = vsyncadd (!%p1568_p2), %s1240_s20, 4294967168  ;;  %s2405_s4 = sadd.s32 4294967294, %s1854_s18   ;;  %p1571_p5 = pnand %p1577_p4, %p2051_p13 }
 0x4f9   : > { %s1248_s30 = sand.u32 1, %s2405_s4  }
 0x4fa   : > { %s1249_s25 = scalar_lea.sflag [#allocation9], %s1248_s30 }
 0x4fb   : > { %1809 = dma.done.wait (!%p1571_p5), %s1249_s25, 256  }
 0x4fc   : > { %1811 = vsyncadd (!%p1571_p5), %s1249_s25, 4294967040  ;;  %s30_s18 = sadd.s32 1, %s1854_s18   ;;  %s2407_s25 = sld [smem:[#allocation13_spill]] }
 0x4fd   : > { %p27_p3 = scmp.ge.s32.totalorder %s30_s18, 10   ;;  %s2408_s26 = sld [smem:[#allocation14_spill]] }
 0x4fe   : > { %s2409_s27 = sld [smem:[#allocation26_spill]]  ;;  %s2410_s28 = sld [smem:[#allocation16_spill]] }
 0x4ff   : > { %s2411_s29 = sld [smem:[#allocation17_spill]]  ;;  %s2412_s30 = sld [smem:[#allocation27_spill]] }
 0x500   : > { %s2413_s14 = sld [smem:[#allocation19_spill]]  ;;  %s2414_s15 = sld [smem:[#allocation20_spill]] }
 0x501   : > { %s2415_s16 = sld [smem:[#allocation21_spill]]  ;;  %s2416_s17 = sld [smem:[#allocation23_spill]] }
 0x502   :  { %29 = sbr.rel (!%p27_p3) target bundleno = 16 (0x10), region = 158 }
 0x509   :  { %1263 = vsyncpa [#allocation7], 1 }
 0x50a   :  { %1265 = vsyncpa [#allocation7 + $0x1], 1 }
 0x50b   :  { %1266 = vsyncpa [#allocation9], 1 }
 0x50c   :  { %1268 = vsyncpa [#allocation9 + $0x1], 1 }

</bundles_post_ra>
